<compile_context>
chip_gen: v5e
topology: v5e:2x2
jax: 0.10.0
libtpu: 0.0.40
codegen_flags: <defaults>
</compile_context>

<pallas_src>
import jax
import jax.numpy as jnp
from jax import lax
from jax.experimental import pallas as pl
from jax.experimental.pallas import tpu as pltpu

# ---------------- model dims (small, consistent with the forward) ----------------
B   = 2      # batch
L   = 16     # encoder frame length (samples per frame)
K   = 128    # number of audio frames  -> T = K * L audio samples
T   = K * L  # raw audio length
N   = 64     # audio encoder feature dim
TV  = 8      # number of lip video frames
IMG = 16     # lip crop spatial size (IMG x IMG, grayscale)
DV  = 32     # visual embedding dim (stand-in for resnet18 frontend output)
HD  = 64     # fusion hidden dim
NB  = N + HD + N + L + DV   # consolidated bias rows = 240

BK  = B * K          # 256 -> lane axis of every audio-rate intermediate
BTV = B * TV         # 16  -> lane axis of the video-rate intermediates
WPR = 4 * HD + L     # 272 rows of the packed weight slab

assert T % L == 0 and K % TV == 0, "framing / temporal upsample assumptions"

WDT = jnp.bfloat16   # MXU-input dtype (f32 accumulation everywhere)


# =============================== Pallas kernel ====================================

def _fused_av_kernel(x_ref, ref_ref, wv_ref, wp_ref, sel_ref, bias_ref, out_ref):
    """Single-program fused AV target-speaker extractor, batch folded onto lanes.

    x_ref   : [BK, L]   bf16  audio frames in natural order (frame-major)
    ref_ref : [BTV, IMG*IMG] bf16 flattened lip crops in natural order
    wv_ref  : [DV, IMG*IMG]  bf16 visual-encoder weight
    wp_ref  : [WPR, HD]      bf16 packed slab [w_fuse_e; w_mask; w_fuse_v|0; w_enc|0; w_dec]
    sel_ref : [BTV, BK]      bf16 block-diagonal 0/1 temporal-upsample selector
    bias_ref: [NB, 1]  f32   [b_enc; b_fuse; b_mask; b_dec; b_v] column biases
    out_ref : [L, BK]  f32   estimated waveform frames, lane-dense
    """
    f32 = jnp.float32
    cdt = wv_ref.dtype                      # MXU compute dtype (bf16)
    NT = (((1,), (1,)), ((), ()))           # contract trailing dims of both operands

    # -------- consolidated column biases (broadcast along the lane axis) ----------
    b_enc  = bias_ref[0:N, :]                           # [N , 1]
    b_fuse = bias_ref[N:N + HD, :]                      # [HD, 1]
    b_mask = bias_ref[N + HD:N + HD + N, :]             # [N , 1]
    b_dec  = bias_ref[N + HD + N:N + HD + N + L, :]     # [L , 1]
    b_v    = bias_ref[N + HD + N + L:NB, :]             # [DV, 1]

    # -------- packed weight slab, static row/col slices ---------------------------
    w_fe  = wp_ref[0:HD, :]                 # [HD, N]
    w_m   = wp_ref[HD:2 * HD, :]            # [N , HD]
    w_fv  = wp_ref[2 * HD:3 * HD, 0:DV]     # [HD, DV]
    w_enc = wp_ref[3 * HD:4 * HD, 0:L]      # [N , L]
    w_dec = wp_ref[4 * HD:4 * HD + L, :]    # [L , N]

    # -------- visual reference encoder (stand-in for resnet18 frontend) -----------
    r = ref_ref[...]                                                       # [BTV, P]
    v = lax.dot_general(wv_ref[...], r, NT, preferred_element_type=f32) + b_v
    v = jnp.maximum(v, 0.0)                                                # [DV, BTV]

    # fusion matmul hoisted ABOVE the temporal upsample (matmul-then-repeat)
    hv = jnp.dot(w_fv, v.astype(cdt), preferred_element_type=f32)          # [HD, BTV]
    # nearest-neighbor upsample TV -> K (per batch) via constant selector matmul
    h_v = jnp.dot(hv.astype(cdt), sel_ref[...], preferred_element_type=f32)  # [HD, BK]

    # -------- audio encoder: Conv1d(kernel==stride) == framewise matmul -----------
    x = x_ref[...]                                                         # [BK, L]
    e = lax.dot_general(w_enc, x, NT, preferred_element_type=f32) + b_enc  # [N, BK]
    e = jnp.maximum(e, 0.0)

    # -------- AV fusion ------------------------------------------------------------
    h = jnp.dot(w_fe, e.astype(cdt), preferred_element_type=f32)
    h = jnp.maximum(h + h_v + b_fuse, 0.0)                                 # [HD, BK]

    # -------- mask estimation -------------------------------------------------------
    m = jax.nn.sigmoid(
        jnp.dot(w_m, h.astype(cdt), preferred_element_type=f32) + b_mask
    )                                                                      # [N, BK]

    # -------- masked decoding back to waveform frames -------------------------------
    em = (e * m).astype(cdt)
    out_ref[...] = jnp.dot(w_dec, em, preferred_element_type=f32) + b_dec  # [L, BK]


# ================================ JAX wrappers ====================================

def _full(shape):
    return pl.BlockSpec(shape, lambda i: (0,) * len(shape))


def av_dprnn_fused(x_bf16, ref_bf16, params):
    """x_bf16: [BK, L] bf16, ref_bf16: [BTV, IMG*IMG] bf16 -> est frames [L, BK] f32."""
    return pl.pallas_call(
        _fused_av_kernel,
        out_shape=jax.ShapeDtypeStruct((L, BK), jnp.float32),
        grid=(1,),
        in_specs=[
            _full((BK, L)),
            _full((BTV, IMG * IMG)),
            _full((DV, IMG * IMG)),
            _full((WPR, HD)),
            _full((BTV, BK)),
            _full((NB, 1)),
        ],
        out_specs=_full((L, BK)),
        compiler_params=pltpu.CompilerParams(dimension_semantics=("arbitrary",)),
    )(x_bf16, ref_bf16, params["w_v_t"], params["w_packed"],
      params["sel"], params["bias"])


def _build_selector():
    """Block-diagonal nearest-neighbor temporal-upsample selector [BTV, BK] (bf16)."""
    rep = K // TV
    row = jnp.arange(BTV)[:, None]
    col = jnp.arange(BK)[None, :]
    same_batch = (row // TV) == (col // K)
    same_frame = (row % TV) == ((col % K) // rep)
    return (same_batch & same_frame).astype(WDT)


def init_params(key):
    ks = jax.random.split(key, 6)
    s = 0.05

    def w(k, shape):
        return (s * jax.random.normal(k, shape, jnp.float32)).astype(WDT)

    w_v_t      = w(ks[0], (DV, IMG * IMG))   # visual frontend (stand-in), transposed
    w_enc_t    = w(ks[1], (N, L))            # audio encoder
    w_fuse_e_t = w(ks[2], (HD, N))           # AV fusion (audio branch)
    w_fuse_v_t = w(ks[3], (HD, DV))          # AV fusion (visual branch)
    w_mask_t   = w(ks[4], (N, HD))           # mask estimator
    w_dec_t    = w(ks[5], (L, N))            # decoder

    # one padded bf16 slab: [w_fuse_e; w_mask; w_fuse_v|0; w_enc|0; w_dec]
    wp = jnp.zeros((WPR, HD), WDT)
    wp = wp.at[0:HD, :].set(w_fuse_e_t)
    wp = wp.at[HD:2 * HD, :].set(w_mask_t)
    wp = wp.at[2 * HD:3 * HD, 0:DV].set(w_fuse_v_t)
    wp = wp.at[3 * HD:4 * HD, 0:L].set(w_enc_t)
    wp = wp.at[4 * HD:4 * HD + L, :].set(w_dec_t)

    return {
        "w_v_t":    w_v_t,
        "w_packed": wp,
        "sel":      _build_selector(),
        # consolidated column biases: [b_enc; b_fuse; b_mask; b_dec; b_v]
        "bias":     jnp.zeros((NB, 1), jnp.float32),
    }


def network_wrapper_forward(params, mixture, ref):
    """Mirrors network_wrapper.forward for the 'av_dprnn' + 'lip' configuration:
         ref = self.ref_encoder(ref)
         return self.sep_network(mixture, ref)
       mixture: [B, T] raw waveform;  ref: [B, TV, IMG, IMG] lip frames.
       returns: [B, T] estimated target-speaker waveform.
    """
    # glue: contiguous reshapes only (no XLA transpose), pre-cast to bf16
    x_bf16   = mixture.reshape(BK, L).astype(WDT)             # [256, 16]
    ref_bf16 = ref.reshape(BTV, IMG * IMG).astype(WDT)        # [16, 256]
    est = av_dprnn_fused(x_bf16, ref_bf16, params)            # [L, BK] f32
    # glue: single small output-side transpose + overlap-free OLA to waveforms
    return est.T.reshape(B, K, L).reshape(B, T)


if __name__ == "__main__":
    key = jax.random.PRNGKey(0)
    k_p, k_m, k_r = jax.random.split(key, 3)
    params = init_params(k_p)

    mixture = jax.random.normal(k_m, (B, T), jnp.float32)           # [2, 2048]
    ref = jax.random.normal(k_r, (B, TV, IMG, IMG), jnp.float32)    # [2, 8, 16, 16]

    out = jax.jit(network_wrapper_forward)(params, mixture, ref)
    out = jax.block_until_ready(out)
    assert out.shape == (B, T) and out.dtype == jnp.float32
    print("KERNEL_OK")
</pallas_src>

<mosaic_0001>
module attributes {stable_mosaic.version = 11 : i64} {
  func.func @_fused_av_kernel(%arg0: i32, %arg1: memref<256x16xbf16, #tpu.memory_space<vmem>>, %arg2: memref<16x256xbf16, #tpu.memory_space<vmem>>, %arg3: memref<32x256xbf16, #tpu.memory_space<vmem>>, %arg4: memref<272x64xbf16, #tpu.memory_space<vmem>>, %arg5: memref<16x256xbf16, #tpu.memory_space<vmem>>, %arg6: memref<240x1xf32, #tpu.memory_space<vmem>>, %arg7: memref<16x256xf32, #tpu.memory_space<vmem>>) attributes {dimension_semantics = [#tpu.dimension_semantics<arbitrary>], iteration_bounds = array<i64: 1>, scalar_prefetch = 0 : i64, scratch_operands = 0 : i64, tpu.core_type = #tpu.core_type<tc>, window_params = [{pipeline_mode = #tpu.pipeline_mode<synchronous>, transform_indices = @transform_0, window_bounds = array<i64: 256, 16>}, {pipeline_mode = #tpu.pipeline_mode<synchronous>, transform_indices = @transform_1, window_bounds = array<i64: 16, 256>}, {pipeline_mode = #tpu.pipeline_mode<synchronous>, transform_indices = @transform_2, window_bounds = array<i64: 32, 256>}, {pipeline_mode = #tpu.pipeline_mode<synchronous>, transform_indices = @transform_3, window_bounds = array<i64: 272, 64>}, {pipeline_mode = #tpu.pipeline_mode<synchronous>, transform_indices = @transform_4, window_bounds = array<i64: 16, 256>}, {pipeline_mode = #tpu.pipeline_mode<synchronous>, transform_indices = @transform_5, window_bounds = array<i64: 240, 1>}, {pipeline_mode = #tpu.pipeline_mode<synchronous>, transform_indices = @transform_6, window_bounds = array<i64: 16, 256>}]} {
    %c0 = arith.constant 0 : index
    %c0_0 = arith.constant 0 : index
    %0 = vector.load %arg6[%c0, %c0_0] : memref<240x1xf32, #tpu.memory_space<vmem>>, vector<64x1xf32>
    %c64 = arith.constant 64 : index
    %c0_1 = arith.constant 0 : index
    %1 = vector.load %arg6[%c64, %c0_1] : memref<240x1xf32, #tpu.memory_space<vmem>>, vector<64x1xf32>
    %c128 = arith.constant 128 : index
    %c0_2 = arith.constant 0 : index
    %2 = vector.load %arg6[%c128, %c0_2] : memref<240x1xf32, #tpu.memory_space<vmem>>, vector<64x1xf32>
    %c192 = arith.constant 192 : index
    %c0_3 = arith.constant 0 : index
    %3 = vector.load %arg6[%c192, %c0_3] : memref<240x1xf32, #tpu.memory_space<vmem>>, vector<16x1xf32>
    %c208 = arith.constant 208 : index
    %c0_4 = arith.constant 0 : index
    %4 = vector.load %arg6[%c208, %c0_4] : memref<240x1xf32, #tpu.memory_space<vmem>>, vector<32x1xf32>
    %c0_5 = arith.constant 0 : index
    %c0_6 = arith.constant 0 : index
    %5 = vector.load %arg4[%c0_5, %c0_6] : memref<272x64xbf16, #tpu.memory_space<vmem>>, vector<64x64xbf16>
    %c64_7 = arith.constant 64 : index
    %c0_8 = arith.constant 0 : index
    %6 = vector.load %arg4[%c64_7, %c0_8] : memref<272x64xbf16, #tpu.memory_space<vmem>>, vector<64x64xbf16>
    %c128_9 = arith.constant 128 : index
    %c0_10 = arith.constant 0 : index
    %7 = vector.load %arg4[%c128_9, %c0_10] : memref<272x64xbf16, #tpu.memory_space<vmem>>, vector<64x32xbf16>
    %c192_11 = arith.constant 192 : index
    %c0_12 = arith.constant 0 : index
    %8 = vector.load %arg4[%c192_11, %c0_12] : memref<272x64xbf16, #tpu.memory_space<vmem>>, vector<64x16xbf16>
    %c256 = arith.constant 256 : index
    %c0_13 = arith.constant 0 : index
    %9 = vector.load %arg4[%c256, %c0_13] : memref<272x64xbf16, #tpu.memory_space<vmem>>, vector<16x64xbf16>
    %c0_14 = arith.constant 0 : index
    %c0_15 = arith.constant 0 : index
    %10 = vector.load %arg2[%c0_14, %c0_15] : memref<16x256xbf16, #tpu.memory_space<vmem>>, vector<16x256xbf16>
    %c0_16 = arith.constant 0 : index
    %c0_17 = arith.constant 0 : index
    %11 = vector.load %arg3[%c0_16, %c0_17] : memref<32x256xbf16, #tpu.memory_space<vmem>>, vector<32x256xbf16>
    %cst = arith.constant dense<0.000000e+00> : vector<32x16xf32>
    %12 = tpu.matmul %11, %10, %cst {dimension_numbers = #tpu.dot_dimension_numbers<[1], [1], [0], [0], [0, 0, 1, 0], [], []>} : vector<32x256xbf16>, vector<16x256xbf16>, vector<32x16xf32> -> vector<32x16xf32>
    %13 = vector.broadcast %4 : vector<32x1xf32> to vector<32x16xf32>
    %14 = arith.addf %12, %13 : vector<32x16xf32>
    %cst_18 = arith.constant 0.000000e+00 : f32
    %15 = vector.broadcast %cst_18 : f32 to vector<32x16xf32>
    %16 = arith.maximumf %14, %15 : vector<32x16xf32>
    %17 = arith.truncf %16 : vector<32x16xf32> to vector<32x16xbf16>
    %cst_19 = arith.constant dense<0.000000e+00> : vector<64x16xf32>
    %18 = tpu.matmul %7, %17, %cst_19 {dimension_numbers = #tpu.dot_dimension_numbers<[1], [0], [0], [1], [0, 0, 1, 1], [], []>} : vector<64x32xbf16>, vector<32x16xbf16>, vector<64x16xf32> -> vector<64x16xf32>
    %19 = arith.truncf %18 : vector<64x16xf32> to vector<64x16xbf16>
    %c0_20 = arith.constant 0 : index
    %c0_21 = arith.constant 0 : index
    %20 = vector.load %arg5[%c0_20, %c0_21] : memref<16x256xbf16, #tpu.memory_space<vmem>>, vector<16x256xbf16>
    %cst_22 = arith.constant dense<0.000000e+00> : vector<64x256xf32>
    %21 = tpu.matmul %19, %20, %cst_22 {dimension_numbers = #tpu.dot_dimension_numbers<[1], [0], [0], [1], [0, 0, 1, 1], [], []>} : vector<64x16xbf16>, vector<16x256xbf16>, vector<64x256xf32> -> vector<64x256xf32>
    %c0_23 = arith.constant 0 : index
    %c0_24 = arith.constant 0 : index
    %22 = vector.load %arg1[%c0_23, %c0_24] : memref<256x16xbf16, #tpu.memory_space<vmem>>, vector<256x16xbf16>
    %cst_25 = arith.constant dense<0.000000e+00> : vector<64x256xf32>
    %23 = tpu.matmul %8, %22, %cst_25 {dimension_numbers = #tpu.dot_dimension_numbers<[1], [1], [0], [0], [0, 0, 1, 0], [], []>} : vector<64x16xbf16>, vector<256x16xbf16>, vector<64x256xf32> -> vector<64x256xf32>
    %24 = vector.broadcast %0 : vector<64x1xf32> to vector<64x256xf32>
    %25 = arith.addf %23, %24 : vector<64x256xf32>
    %cst_26 = arith.constant 0.000000e+00 : f32
    %26 = vector.broadcast %cst_26 : f32 to vector<64x256xf32>
    %27 = arith.maximumf %25, %26 : vector<64x256xf32>
    %28 = arith.truncf %27 : vector<64x256xf32> to vector<64x256xbf16>
    %cst_27 = arith.constant dense<0.000000e+00> : vector<64x256xf32>
    %29 = tpu.matmul %5, %28, %cst_27 {dimension_numbers = #tpu.dot_dimension_numbers<[1], [0], [0], [1], [0, 0, 1, 1], [], []>} : vector<64x64xbf16>, vector<64x256xbf16>, vector<64x256xf32> -> vector<64x256xf32>
    %30 = arith.addf %29, %21 : vector<64x256xf32>
    %31 = vector.broadcast %1 : vector<64x1xf32> to vector<64x256xf32>
    %32 = arith.addf %30, %31 : vector<64x256xf32>
    %cst_28 = arith.constant 0.000000e+00 : f32
    %33 = vector.broadcast %cst_28 : f32 to vector<64x256xf32>
    %34 = arith.maximumf %32, %33 : vector<64x256xf32>
    %35 = arith.truncf %34 : vector<64x256xf32> to vector<64x256xbf16>
    %cst_29 = arith.constant dense<0.000000e+00> : vector<64x256xf32>
    %36 = tpu.matmul %6, %35, %cst_29 {dimension_numbers = #tpu.dot_dimension_numbers<[1], [0], [0], [1], [0, 0, 1, 1], [], []>} : vector<64x64xbf16>, vector<64x256xbf16>, vector<64x256xf32> -> vector<64x256xf32>
    %37 = vector.broadcast %2 : vector<64x1xf32> to vector<64x256xf32>
    %38 = arith.addf %36, %37 : vector<64x256xf32>
    %39 = arith.negf %38 : vector<64x256xf32>
    %40 = math.exp %39 : vector<64x256xf32>
    %cst_30 = arith.constant 1.000000e+00 : f32
    %41 = vector.broadcast %cst_30 : f32 to vector<64x256xf32>
    %42 = arith.addf %41, %40 : vector<64x256xf32>
    %43 = arith.divf %41, %42 : vector<64x256xf32>
    %44 = arith.mulf %27, %43 : vector<64x256xf32>
    %45 = arith.truncf %44 : vector<64x256xf32> to vector<64x256xbf16>
    %cst_31 = arith.constant dense<0.000000e+00> : vector<16x256xf32>
    %46 = tpu.matmul %9, %45, %cst_31 {dimension_numbers = #tpu.dot_dimension_numbers<[1], [0], [0], [1], [0, 0, 1, 1], [], []>} : vector<16x64xbf16>, vector<64x256xbf16>, vector<16x256xf32> -> vector<16x256xf32>
    %47 = vector.broadcast %3 : vector<16x1xf32> to vector<16x256xf32>
    %48 = arith.addf %46, %47 : vector<16x256xf32>
    %c0_32 = arith.constant 0 : index
    %c0_33 = arith.constant 0 : index
    %49 = vector.load %arg7[%c0_32, %c0_33] : memref<16x256xf32, #tpu.memory_space<vmem>>, vector<16x256xf32>
    tpu.vector_store %arg7[%c0_32, %c0_33], %48 {strides = array<i32>} : memref<16x256xf32, #tpu.memory_space<vmem>>, vector<16x256xf32>,
    return
  }
  func.func @transform_0(%arg0: i32) -> (i32, i32) {
    %c0_i32 = arith.constant 0 : i32
    %c0_i32_0 = arith.constant 0 : i32
    %c0_i32_1 = arith.constant 0 : i32
    return %c0_i32, %c0_i32_0 : i32, i32
  }
  func.func @transform_1(%arg0: i32) -> (i32, i32) {
    %c0_i32 = arith.constant 0 : i32
    %c0_i32_0 = arith.constant 0 : i32
    %c0_i32_1 = arith.constant 0 : i32
    return %c0_i32, %c0_i32_0 : i32, i32
  }
  func.func @transform_2(%arg0: i32) -> (i32, i32) {
    %c0_i32 = arith.constant 0 : i32
    %c0_i32_0 = arith.constant 0 : i32
    %c0_i32_1 = arith.constant 0 : i32
    return %c0_i32, %c0_i32_0 : i32, i32
  }
  func.func @transform_3(%arg0: i32) -> (i32, i32) {
    %c0_i32 = arith.constant 0 : i32
    %c0_i32_0 = arith.constant 0 : i32
    %c0_i32_1 = arith.constant 0 : i32
    return %c0_i32, %c0_i32_0 : i32, i32
  }
  func.func @transform_4(%arg0: i32) -> (i32, i32) {
    %c0_i32 = arith.constant 0 : i32
    %c0_i32_0 = arith.constant 0 : i32
    %c0_i32_1 = arith.constant 0 : i32
    return %c0_i32, %c0_i32_0 : i32, i32
  }
  func.func @transform_5(%arg0: i32) -> (i32, i32) {
    %c0_i32 = arith.constant 0 : i32
    %c0_i32_0 = arith.constant 0 : i32
    %c0_i32_1 = arith.constant 0 : i32
    return %c0_i32, %c0_i32_0 : i32, i32
  }
  func.func @transform_6(%arg0: i32) -> (i32, i32) {
    %c0_i32 = arith.constant 0 : i32
    %c0_i32_0 = arith.constant 0 : i32
    %c0_i32_1 = arith.constant 0 : i32
    return %c0_i32, %c0_i32_0 : i32, i32
  }
}

</mosaic_0001>

<bundles_post_ra>
// kernel: network_wrapper_forward.1
= control target key start
LH: loop header
LB: loop body
LE: loop exit
PB: predicated region body
PF: predicated region fallthrough
CT: control target
= control target key end

     0   :  { %v1669_v0 = vmov 0   ;;  %vm266_vm0 = vcmask 130048   ;;  %vm208_vm1 = vcmask 261120   ;;  %vm2706_vm2 = vcmask 523264   ;;  %s2673_s5 = inlined_call_operand.vmem [shape: f32[240,1], index: 5, kind: input, shape index: {}]   ;;  %s2674_s1 = inlined_call_operand.vmem [shape: bf16[16,256], index: 1, kind: input, shape index: {}]   ;;  %s2675_s0 = inlined_call_operand.vmem [shape: bf16[256,16], index: 0, kind: input, shape index: {}]   ;;  %s2676_s2 = inlined_call_operand.vmem [shape: bf16[32,256], index: 2, kind: input, shape index: {}]   ;;  %s2677_s3 = inlined_call_operand.vmem [shape: bf16[272,64], index: 3, kind: input, shape index: {}]   ;;  %s2678_s4 = inlined_call_operand.vmem [shape: bf16[16,256], index: 4, kind: input, shape index: {}]   ;;  %s2679_s6 = inlined_call_operand.vmem [shape: f32[16,256], index: 6, kind: output, shape index: {}]  }
   0x1   :  { %1603 = vset.pattern.permute.xlu1 %v1669_v0  ;;  %1602 = vset.pattern.permute.xlu0 %v1669_v0  ;;  %v52_v1 = vld [vmem:[%s2673_s5 + $0xe0] sm:$0xff]  ;;  %v50_v2 = vld [vmem:[%s2673_s5 + $0xd0] sm:$0xff]  ;;  %v1570_v4 = vld [vmem:[%s2674_s1 + $0x4] sm:$0xf0] }
   0x2   :  { %v1352_v3 = vld [vmem:[%s2674_s1] sm:$0xf]  ;;  %106 = vperm.xlu0 %1602, %v52_v1   ;;  %96 = vperm.xlu1 %1603, %v50_v2   ;;  %v1569_v5 = vld [vmem:[%s2674_s1 + $0x4] sm:$0xf]  ;;  %v1354_v6 = vld [vmem:[%s2674_s1 + $0x8] sm:$0xf0] }
   0x3   :  { %v1353_v7 = vor.u32 %v1570_v4, %v1352_v3  ;;  %v1357_v8 = vor.u32 %v1569_v5, %v1354_v6  ;;  %v1592_v9 = vld [vmem:[%s2675_s0 + $0x78] sm:$0xff]  ;;  %1604 = vset.pattern.permute.xlu2 %v1669_v0  ;;  %v1336_v10 = vld [vmem:[%s2676_s2] sm:$0xf]  ;;  %v1572_v11 = vld [vmem:[%s2676_s2 + $0x4] sm:$0xf0] }
   0x4   :  { %v1733_v12 = vsel %vm266_vm0, %v1592_v9, 0  ;;  %v1571_v13 = vld [vmem:[%s2676_s2 + $0x4] sm:$0xf]  ;;  %v1338_v14 = vld [vmem:[%s2676_s2 + $0x8] sm:$0xf0]  ;;  %v51_v16 = vld [vmem:[%s2673_s5 + $0xd8] sm:$0xff]  ;;  %v1337_v18 = vor.u32 %v1572_v11, %v1336_v10 }
   0x5   :  { %151 = vmatpush.bf16.xpose.msra.mxu0 %v1353_v7  ;;  %170 = vmatpush.bf16.xpose.msra.mxu1 %v1357_v8  ;;  %v53_v15 = vld [vmem:[%s2673_s5 + $0xe8] sm:$0xff]  ;;  %v1591_v17 = vld [vmem:[%s2675_s0 + $0x70] sm:$0xff]  ;;  %v1341_v19 = vor.u32 %v1571_v13, %v1338_v14  ;;  %v28_v22 = vld [vmem:[%s2673_s5 + $0x20] sm:$0xff] }
   0x6   :  { %v1752_v20 = vsel %vm266_vm0, %v1591_v17, 0  ;;  %v29_v21 = vld [vmem:[%s2673_s5 + $0x28] sm:$0xff]  ;;  %v1344_v25 = vld [vmem:[%s2676_s2 + $0x10] sm:$0xf]  ;;  %v1574_v26 = vld [vmem:[%s2676_s2 + $0x14] sm:$0xf0] }
   0x7   :  { %v1590_v23 = vld [vmem:[%s2675_s0 + $0x68] sm:$0xff]  ;;  %v1573_v27 = vld [vmem:[%s2676_s2 + $0x14] sm:$0xf]  ;;  %v1346_v28 = vld [vmem:[%s2676_s2 + $0x18] sm:$0xf0]  ;;  %v1345_v32 = vor.u32 %v1574_v26, %v1344_v25 }
   0x8   :  { %v1765_v24 = vsel %vm266_vm0, %v1590_v23, 0  ;;  %v27_v29 = vld [vmem:[%s2673_s5 + $0x18] sm:$0xff]  ;;  %v24_v30 = vld [vmem:[%s2673_s5] sm:$0xff]  ;;  %v1349_v33 = vor.u32 %v1573_v27, %v1346_v28  ;;  %v38_v35 = vld [vmem:[%s2673_s5 + $0x70] sm:$0xff] }
   0x9   :  { %v1589_v31 = vld [vmem:[%s2675_s0 + $0x60] sm:$0xff]  ;;  %v39_v36 = vld [vmem:[%s2673_s5 + $0x78] sm:$0xff]  ;;  %v37_v39 = vld [vmem:[%s2673_s5 + $0x68] sm:$0xff] }
   0xa   :  { %111 = vperm.xlu0 %1602, %v53_v15   ;;  %101 = vperm.xlu1 %1603, %v51_v16   ;;  %v1790_v34 = vsel %vm266_vm0, %v1589_v31, 0  ;;  %v1588_v37 = vld [vmem:[%s2675_s0 + $0x58] sm:$0xff]  ;;  %v34_v40 = vld [vmem:[%s2673_s5 + $0x50] sm:$0xff]  ;;  %v32_v43 = vld [vmem:[%s2673_s5 + $0x40] sm:$0xff] }
   0xb   :  { %v1803_v38 = vsel %vm266_vm0, %v1588_v37, 0  ;;  %v1587_v41 = vld [vmem:[%s2675_s0 + $0x50] sm:$0xff]  ;;  %v33_v44 = vld [vmem:[%s2673_s5 + $0x48] sm:$0xff]  ;;  %v47_v48 = vld [vmem:[%s2673_s5 + $0xb8] sm:$0xff] }
   0xc   :  { %152 = vmatmul.bf16.vlgmr.msra.gmra.mxu0 %v1337_v18  ;;  %171 = vmatmul.bf16.vlgmr.msra.gmra.mxu1 %v1341_v19  ;;  %v1816_v42 = vsel %vm266_vm0, %v1587_v41, 0  ;;  %v1586_v45 = vld [vmem:[%s2675_s0 + $0x48] sm:$0xff]  ;;  %v30_v47 = vld [vmem:[%s2673_s5 + $0x30] sm:$0xff]  ;;  %v44_v49 = vld [vmem:[%s2673_s5 + $0xa0] sm:$0xff] }
   0xd   :  { %1593 = vmatpush.bf16.xpose.msrb.mxu1 %v1733_v12  ;;  %v1829_v46 = vsel %vm266_vm0, %v1586_v45, 0  ;;  %401 = vperm.xlu2 %1604, %v30_v47   ;;  %v1585_v50 = vld [vmem:[%s2675_s0 + $0x40] sm:$0xff]  ;;  %v31_v52 = vld [vmem:[%s2673_s5 + $0x38] sm:$0xff]  ;;  %v42_v53 = vld [vmem:[%s2673_s5 + $0x90] sm:$0xff] }
   0xe   :  { %v1845_v51 = vsel %vm266_vm0, %v1585_v50, 0  ;;  %v43_v54 = vld [vmem:[%s2673_s5 + $0x98] sm:$0xff]  ;;  %v1860_v55 = vld [vmem:[%s2677_s3 + $0x68] sm:$0xff]  ;;  %v26_v56 = vld [vmem:[%s2673_s5 + $0x10] sm:$0xff] }
   0xf   :  { %v41_v57 = vld [vmem:[%s2673_s5 + $0x88] sm:$0xff]  ;;  %v48_v58 = vld [vmem:[%s2673_s5 + $0xc0] sm:$0xff]  ;;  %v1876_v59 = vld [vmem:[%s2677_s3 + $0x70] sm:$0xff] }
  0x10   :  { %v1883_v0 = vld [vmem:[%s2677_s3 + $0x78] sm:$0xff]  ;;  %v1560_v26 = vld [vmem:[%s2677_s3 + $0x40] sm:$0xff]  ;;  %v1561_v27 = vld [vmem:[%s2677_s3 + $0x48] sm:$0xff] }
  0x11   :  { %v1575_v28 = vld [vmem:[%s2678_s4 + $0x4] sm:$0xf]  ;;  %v1562_v31 = vld [vmem:[%s2677_s3 + $0x50] sm:$0xff] }
  0x12   :  { %396 = vperm.xlu1 %1603, %v29_v21   ;;  %391 = vperm.xlu0 %1602, %v28_v22  }
  0x15   :  { %1594 = vmatpush.bf16.xpose.msrb.mxu1 %v1752_v20  ;;  %406 = vperm.xlu2 %1604, %v31_v52  }
  0x1a   :  { %386 = vperm.xlu0 %1602, %v27_v29   ;;  %371 = vperm.xlu1 %1603, %v24_v30   ;;  %v1382_v29 = vld [vmem:[%s2678_s4 + $0x8] sm:$0xf0] }
  0x1b   :  { %v1385_v30 = vor.u32 %v1575_v28, %v1382_v29 }
  0x1c   :  { %157 = vmatmul.bf16.gmra.mxu0 %v1345_v32  ;;  %176 = vmatmul.bf16.gmra.mxu1 %v1349_v33  ;;  %v1563_v32 = vld [vmem:[%s2677_s3 + $0x58] sm:$0xff] }
  0x1d   :  { %1595 = vmatpush.bf16.xpose.msrb.mxu1 %v1765_v24  ;;  %381 = vperm.xlu2 %1604, %v26_v56  }
  0x1e   :  { %315 = vmatpush.bf16.msrb.mxu0 %v1385_v30  ;;  %v1564_v30 = vld [vmem:[%s2677_s3 + $0x60] sm:$0xff] }
  0x22   :  { %774 = vperm.xlu0 %1602, %v38_v35   ;;  %779 = vperm.xlu1 %1603, %v39_v36   ;;  %v1584_v36 = vld [vmem:[%s2675_s0 + $0x38] sm:$0xff] }
  0x23   :  { %598 = vmatpush.bf16.xpose.msra.mxu0 %v1733_v12 }
  0x25   :  { %1596 = vmatpush.bf16.xpose.msrb.mxu1 %v1790_v34 }
  0x2a   :  { %769 = vperm.xlu0 %1602, %v37_v39   ;;  %754 = vperm.xlu1 %1603, %v34_v40   ;;  %v1583_v39 = vld [vmem:[%s2675_s0 + $0x30] sm:$0xff] }
  0x2b   :  { %599 = vmatpush.bf16.xpose.msra.mxu0 %v1752_v20 }
  0x2d   :  { %1597 = vmatpush.bf16.xpose.msrb.mxu1 %v1803_v38 }
  0x32   :  { %744 = vperm.xlu0 %1602, %v32_v43   ;;  %749 = vperm.xlu1 %1603, %v33_v44   ;;  %v1582_v43 = vld [vmem:[%s2675_s0 + $0x28] sm:$0xff] }
  0x33   :  { %600 = vmatpush.bf16.xpose.msra.mxu0 %v1765_v24  ;;  %v1380_v24 = vld [vmem:[%s2678_s4] sm:$0xf]  ;;  %v537_v44 = vsel %vm266_vm0, %v1582_v43, 0 }
  0x35   :  { %1598 = vmatpush.bf16.xpose.msrb.mxu1 %v1816_v42 }
  0x3a   :  { %859 = vperm.xlu0 %1602, %v47_v48   ;;  %844 = vperm.xlu1 %1603, %v44_v49  }
  0x3b   :  { %601 = vmatpush.bf16.xpose.msra.mxu0 %v1790_v34  ;;  %v1576_v34 = vld [vmem:[%s2678_s4 + $0x4] sm:$0xf0] }
  0x3c   :  { %v1381_v35 = vor.u32 %v1576_v34, %v1380_v24  ;;  %v49_v24 = vld [vmem:[%s2673_s5 + $0xc8] sm:$0xff] }
  0x3d   :  { %1599 = vmatpush.bf16.xpose.msrb.mxu1 %v1829_v46 }
  0x3e   :  { %286 = vmatpush.bf16.msra.mxu3 %v1381_v35 }
  0x42   :  { %834 = vperm.xlu0 %1602, %v42_v53   ;;  %839 = vperm.xlu1 %1603, %v43_v54  }
  0x43   :  { %602 = vmatpush.bf16.xpose.msra.mxu0 %v1803_v38  ;;  %v543_v38 = vsel %vm266_vm0, %v1584_v36, 0 }
  0x44   :  { %569 = vmatpush.bf16.xpose.msrb.mxu3 %v543_v38 }
  0x45   :  { %1600 = vmatpush.bf16.xpose.msrb.mxu1 %v1845_v51 }
  0x4a   :  { %829 = vperm.xlu0 %1602, %v41_v57   ;;  %1282 = vperm.xlu1 %1603, %v48_v58  }
  0x4b   :  { %603 = vmatpush.bf16.xpose.msra.mxu0 %v1816_v42  ;;  %v540_v42 = vsel %vm266_vm0, %v1583_v39, 0 }
  0x4c   :  { %1479 = vmatmul.msk.bf16.vlgmr.msrb.gmra.mxu1 %vm266_vm0, %v1860_v55  ;;  %570 = vmatpush.bf16.xpose.msrb.mxu3 %v540_v42 }
  0x53   :  { %604 = vmatpush.bf16.xpose.msra.mxu0 %v1829_v46 }
  0x54   :  { %571 = vmatpush.bf16.xpose.msrb.mxu3 %v537_v44 }
  0x5b   :  { %605 = vmatpush.bf16.xpose.msra.mxu0 %v1845_v51  ;;  %v1581_v51 = vld [vmem:[%s2675_s0 + $0x20] sm:$0xff] }
  0x5c   :  { %1480 = vmatmul.msk.bf16.gmra.mxu1 %vm266_vm0, %v1876_v59  ;;  %v534_v52 = vsel %vm266_vm0, %v1581_v51, 0 }
  0x5d   :  { %572 = vmatpush.bf16.xpose.msrb.mxu3 %v534_v52 }
  0x67   :  { %v1930_v40 = vpop.permute.xlu2 %401 }
  0x6c   :  { %1481 = vmatmul.msk.bf16.gmra.mxu1 %vm266_vm0, %v1883_v0 }
  0x6f   :  { %v1937_v45 = vpop.permute.xlu2 %406 }
  0x74   :  { %v97_v1 = vpop.permute.xlu1 %96  ;;  %v107_v2 = vpop.permute.xlu0 %106 }
  0x77   :  { %v1958_v58 = vpop.permute.xlu2 %381 }
  0x7c   :  { %v102_v6 = vpop.permute.xlu1 %101  ;;  %v112_v8 = vpop.permute.xlu0 %111 }
  0x84   :  { %v1939_v47 = vpop.permute.xlu0 %391  ;;  %v1953_v56 = vpop.permute.xlu1 %396 }
  0x89   :  { %v153_v60 = vpop.f32.mrf.mxu0  ;;  %v172_v61 = vpop.f32.mrf.mxu1 }
  0x8a   :  { %v154_v10 = vadd.f32 %v153_v60, %v97_v1 }
  0x8c   :  { %v173_v17 = vadd.f32 %v172_v61, %v154_v10 }
  0x8e   :  { %v182_v23 = vmax.f32 %v173_v17, 0.0 }
  0x91   :  { %v155_v62 = vpop.f32.mrf.mxu0  ;;  %v174_v63 = vpop.f32.mrf.mxu1 }
  0x92   :  { %v156_v7 = vadd.f32 %v155_v62, %v102_v6 }
  0x94   :  { %v175_v15 = vadd.f32 %v174_v63, %v156_v7  ;;  %v1967_v63 = vpop.permute.xlu0 %386 }
  0x96   :  { %v183_v21 = vmax.f32 %v175_v15, 0.0 }
  0x98   :  { %v186_v25 = vpack.c.bf16 %v183_v21, %v182_v23  ;;  %v1577_v21 = vld [vmem:[%s2675_s0] sm:$0xff] }
  0x99   :  { %v158_v3 = vpop.f32.mrf.mxu0  ;;  %v177_v4 = vpop.f32.mrf.mxu1  ;;  %v522_v23 = vsel %vm266_vm0, %v1577_v21, 0  ;;  %v1553_v21 = vld [vmem:[%s2677_s3 + $0x8] sm:$0xff] }
  0x9a   :  { %v159_v5 = vadd.f32 %v158_v3, %v107_v2 }
  0x9c   :  { %v178_v11 = vadd.f32 %v177_v4, %v159_v5  ;;  %v1580_v5 = vld [vmem:[%s2675_s0 + $0x18] sm:$0xff] }
  0x9d   :  { %v531_v7 = vsel %vm266_vm0, %v1580_v5, 0 }
  0x9e   :  { %v184_v18 = vmax.f32 %v178_v11, 0.0  ;;  %573 = vmatpush.bf16.xpose.msrb.mxu3 %v531_v7 }
  0xa1   :  { %v160_v9 = vpop.f32.mrf.mxu0  ;;  %v179_v14 = vpop.f32.mrf.mxu1 }
  0xa2   :  { %v161_v13 = vadd.f32 %v160_v9, %v112_v8 }
  0xa4   :  { %v180_v16 = vadd.f32 %v179_v14, %v161_v13  ;;  %v1579_v13 = vld [vmem:[%s2675_s0 + $0x10] sm:$0xff] }
  0xa5   :  { %v528_v15 = vsel %vm266_vm0, %v1579_v13, 0 }
  0xa6   :  { %v185_v19 = vmax.f32 %v180_v16, 0.0  ;;  %574 = vmatpush.bf16.xpose.msrb.mxu3 %v528_v15 }
  0xa8   :  { %v187_v22 = vpack.c.bf16 %v185_v19, %v184_v18  ;;  %v1578_v18 = vld [vmem:[%s2675_s0 + $0x8] sm:$0xff] }
  0xa9   :  { %v525_v19 = vsel %vm266_vm0, %v1578_v18, 0 }
  0xaa   :  { %227 = vmatpush.bf16.msra.mxu2 %v187_v22 }
  0xae   :  { %228 = vmatpush.bf16.msra.mxu2 %v186_v25  ;;  %575 = vmatpush.bf16.xpose.msrb.mxu3 %v525_v19 }
  0xb1   :  { %1374 = vmatmul.msk.bf16.vlgmr.msra.gmra.mxu2 %vm208_vm1, %v1560_v26 }
  0xb6   :  { %576 = vmatpush.bf16.xpose.msrb.mxu3 %v522_v23 }
  0xc1   :  { %1375 = vmatmul.msk.bf16.gmra.mxu2 %vm208_vm1, %v1561_v27 }
  0xc9   :  { %v612_v12 = vpop.f32.mrf.mxu1 }
  0xca   :  { %v1970_v2 = vadd.f32 %v612_v12, %v1958_v58  ;;  %v35_v12 = vld [vmem:[%s2673_s5 + $0x58] sm:$0xff] }
  0xcc   :  { %2710 = vst [vmem:[#allocation5_spill] sm:$0xff] %v1970_v2  ;;  %v2682_v8 = vmax.f32 %v1970_v2, 0.0 }
  0xd1   :  { %1376 = vmatmul.msk.bf16.gmra.mxu2 %vm208_vm1, %v1562_v31  ;;  %v614_v20 = vpop.f32.mrf.mxu1  ;;  %v25_v31 = vld [vmem:[%s2673_s5 + $0x8] sm:$0xff] }
  0xd2   :  { %v1973_v3 = vadd.f32 %v614_v20, %v1967_v63  ;;  %376 = vperm.xlu2 %1604, %v25_v31   ;;  %v46_v20 = vld [vmem:[%s2673_s5 + $0xb0] sm:$0xff] }
  0xd4   :  { %2711 = vst [vmem:[#allocation6_spill] sm:$0xff] %v1973_v3  ;;  %v2683_v9 = vmax.f32 %v1973_v3, 0.0 }
  0xd6   :  { %v646_v14 = vpack.c.bf16 %v2683_v9, %v2682_v8 }
  0xd9   :  { %v617_v33 = vpop.f32.mrf.mxu1 }
  0xda   :  { %v1961_v60 = vadd.f32 %v617_v33, %v1939_v47  ;;  %v45_v33 = vld [vmem:[%s2673_s5 + $0xa8] sm:$0xff] }
  0xdc   :  { %2709 = vst [vmem:[#allocation4_spill] sm:$0xff] %v1961_v60  ;;  %v2684_v6 = vmax.f32 %v1961_v60, 0.0 }
  0xe1   :  { %1377 = vmatmul.msk.bf16.gmra.mxu2 %vm208_vm1, %v1563_v32  ;;  %v619_v37 = vpop.f32.mrf.mxu1  ;;  %v36_v32 = vld [vmem:[%s2673_s5 + $0x60] sm:$0xff] }
  0xe2   :  { %v1956_v57 = vadd.f32 %v619_v37, %v1953_v56  ;;  %764 = vperm.xlu2 %1604, %v36_v32  }
  0xe4   :  { %2708 = vst [vmem:[#allocation3_spill] sm:$0xff] %v1956_v57  ;;  %v2685_v4 = vmax.f32 %v1956_v57, 0.0 }
  0xe6   :  { %v648_v10 = vpack.c.bf16 %v2685_v4, %v2684_v6 }
  0xe9   :  { %v622_v41 = vpop.f32.mrf.mxu1 }
  0xea   :  { %v1942_v48 = vadd.f32 %v622_v41, %v1930_v40  ;;  %759 = vperm.xlu2 %1604, %v35_v12  }
  0xec   :  { %2707 = vst [vmem:[#allocation2_spill] sm:$0xff] %v1942_v48  ;;  %v2686_v53 = vmax.f32 %v1942_v48, 0.0 }
  0xf1   :  { %v624_v46 = vpop.f32.mrf.mxu1 }
  0xf2   :  { %v1945_v50 = vadd.f32 %v624_v46, %v1937_v45  ;;  %854 = vperm.xlu2 %1604, %v46_v20  }
  0xf4   :  { %v2688_v54 = vmax.f32 %v1945_v50, 0.0 }
  0xf6   :  { %v650_v61 = vpack.c.bf16 %v2688_v54, %v2686_v53 }
  0xfa   :  { %849 = vperm.xlu2 %1604, %v45_v33  }
 0x12c   :  { %v377_v7 = vpop.permute.xlu2 %376 }
 0x134   :  { %v230_v49 = vpop.f32.mrf.mxu2 }
 0x13c   :  { %v232_v62 = vpop.f32.mrf.mxu2 }
 0x13d   :  { %v250_v1 = vpack.c.bf16 %v232_v62, %v230_v49  ;;  %v372_v62 = vpop.permute.xlu1 %371 }
 0x13f   :  { %1386 = vmatmul.msk.bf16.vlgmr.msra.gmra.mxu3 %vm266_vm0, %v250_v1  ;;  %1390 = vmatmul.msk.bf16.vlgmr.msrb.gmra.mxu0 %vm266_vm0, %v250_v1 }
 0x140   :  { %717 = vmatpush.bf16.msrb.mxu0 %v650_v61 }
 0x144   :  { %718 = vmatpush.bf16.msrb.mxu0 %v648_v10  ;;  %v235_v11 = vpop.f32.mrf.mxu2 }
 0x148   :  { %719 = vmatpush.bf16.msrb.mxu0 %v646_v14 }
 0x14c   :  { %v237_v16 = vpop.f32.mrf.mxu2 }
 0x14d   :  { %v251_v17 = vpack.c.bf16 %v237_v16, %v235_v11 }
 0x14f   :  { %1387 = vmatmul.msk.bf16.gmra.mxu3 %vm266_vm0, %v251_v17  ;;  %1391 = vmatmul.msk.bf16.gmra.mxu0 %vm266_vm0, %v251_v17  ;;  %v1552_v17 = vld [vmem:[%s2677_s3] sm:$0xff] }
 0x154   :  { %v240_v22 = vpop.f32.mrf.mxu2 }
 0x15c   :  { %v242_v25 = vpop.f32.mrf.mxu2 }
 0x15d   :  { %v252_v26 = vpack.c.bf16 %v242_v25, %v240_v22  ;;  %v1554_v25 = vld [vmem:[%s2677_s3 + $0x10] sm:$0xff] }
 0x15f   :  { %1388 = vmatmul.msk.bf16.gmra.mxu3 %vm266_vm0, %v252_v26  ;;  %1392 = vmatmul.msk.bf16.gmra.mxu0 %vm266_vm0, %v252_v26 }
 0x164   :  { %v245_v27 = vpop.f32.mrf.mxu2 }
 0x16c   :  { %v247_v28 = vpop.f32.mrf.mxu2 }
 0x16d   :  { %v253_v29 = vpack.c.bf16 %v247_v28, %v245_v27 }
 0x16f   :  { %1389 = vmatmul.msk.bf16.gmra.mxu3 %vm266_vm0, %v253_v29  ;;  %1393 = vmatmul.msk.bf16.gmra.mxu0 %vm266_vm0, %v253_v29  ;;  %v1555_v29 = vld [vmem:[%s2677_s3 + $0x18] sm:$0xff] }
 0x17f   :  { %1474 = vmatmul.msk.bf16.vlgmr.msrb.gmra.mxu3 %vm266_vm0, %v1564_v30  ;;  %1478 = vmatmul.msk.bf16.vlgmr.msra.gmra.mxu0 %vm266_vm0, %v1564_v30 }
 0x18f   :  { %1475 = vmatmul.msk.bf16.gmra.mxu3 %vm266_vm0, %v1860_v55  ;;  %v40_v55 = vld [vmem:[%s2673_s5 + $0x80] sm:$0xff] }
 0x190   :  { %824 = vperm.xlu2 %1604, %v40_v55  }
 0x198   :  { %1287 = vperm.xlu2 %1604, %v49_v24  }
 0x19f   :  { %1476 = vmatmul.msk.bf16.gmra.mxu3 %vm266_vm0, %v1876_v59 }
 0x1af   :  { %1477 = vmatmul.msk.bf16.gmra.mxu3 %vm266_vm0, %v1883_v0 }
 0x1bc   :  { %v2043_v34 = vpop.f32.mrf.mxu0 }
 0x1c2   :  { %v2045_v59 = vpop.f32.mrf.mxu3 }
 0x1c4   :  { %v2047_v35 = vpop.f32.mrf.mxu0 }
 0x1ca   :  { %v2049_v36 = vpop.f32.mrf.mxu3 }
 0x1cc   :  { %v2051_v37 = vpop.f32.mrf.mxu0 }
 0x1d2   :  { %v2053_v38 = vpop.f32.mrf.mxu3 }
 0x1d4   :  { %v2055_v39 = vpop.f32.mrf.mxu0 }
 0x1da   :  { %v2057_v0 = vpop.f32.mrf.mxu3 }
 0x1dc   :  { %v2059_v41 = vpop.f32.mrf.mxu0 }
 0x1e2   :  { %v2061_v42 = vpop.f32.mrf.mxu3 }
 0x1e4   :  { %v2063_v43 = vpop.f32.mrf.mxu0 }
 0x1ea   :  { %v2065_v44 = vpop.f32.mrf.mxu3 }
 0x1ec   :  { %v2067_v46 = vpop.f32.mrf.mxu0 }
 0x1f2   :  { %v2069_v49 = vpop.f32.mrf.mxu3 }
 0x1f4   :  { %v2071_v51 = vpop.f32.mrf.mxu0 }
 0x1fa   :  { %v2073_v52 = vpop.f32.mrf.mxu3 }
 0x1fc   :  { %v607_v61 = vpop.f32.mrf.mxu0 }
 0x1fd   :  { %v2075_v5 = vadd.f32 %v607_v61, %v372_v62 }
 0x1ff   :  { %2712 = vst [vmem:[#allocation7_spill] sm:$0xff] %v2075_v5  ;;  %v2680_v13 = vmax.f32 %v2075_v5, 0.0 }
 0x202   :  { %v578_v1 = vpop.f32.mrf.mxu3 }
 0x203   :  { %v2134_v61 = vadd.f32 %v578_v1, %v372_v62 }
 0x204   :  { %v609_v10 = vpop.f32.mrf.mxu0 }
 0x205   :  { %v2077_v11 = vadd.f32 %v609_v10, %v377_v7  ;;  %2714 = vst [vmem:[#allocation9_spill] sm:$0xff] %v2134_v61 }
 0x207   :  { %2713 = vst [vmem:[#allocation8_spill] sm:$0xff] %v2077_v11  ;;  %v2681_v14 = vmax.f32 %v2077_v11, 0.0 }
 0x209   :  { %v644_v15 = vpack.c.bf16 %v2681_v14, %v2680_v13 }
 0x20a   :  { %v580_v16 = vpop.f32.mrf.mxu3 }
 0x20b   :  { %720 = vmatpush.bf16.msrb.mxu0 %v644_v15  ;;  %v2127_v55 = vadd.f32 %v580_v16, %v377_v7  ;;  %v2687_v15 = vmax.f32 %v2134_v61, 0.0 }
 0x20e   :  { %1502 = vmatmul.msk.bf16.vlgmr.msrb.gmra.mxu0 %vm2706_vm2, %v1552_v17 }
 0x212   :  { %v583_v18 = vpop.f32.mrf.mxu3 }
 0x21a   :  { %v585_v19 = vpop.f32.mrf.mxu3 }
 0x21e   :  { %1503 = vmatmul.msk.bf16.gmra.mxu0 %vm2706_vm2, %v1553_v21 }
 0x222   :  { %v588_v22 = vpop.f32.mrf.mxu3 }
 0x223   :  { %v2110_v32 = vadd.f32 %v588_v22, %v1939_v47 }
 0x225   :  { %v2692_v47 = vmax.f32 %v2110_v32, 0.0 }
 0x22a   :  { %v590_v23 = vpop.f32.mrf.mxu3 }
 0x22b   :  { %v2104_v30 = vadd.f32 %v590_v23, %v1953_v56  ;;  %v2124_v56 = vadd.f32 %v583_v18, %v1958_v58  ;;  %v2689_v58 = vmax.f32 %v2127_v55, 0.0 }
 0x22d   :  { %v2693_v33 = vmax.f32 %v2104_v30, 0.0  ;;  %v2690_v10 = vmax.f32 %v2124_v56, 0.0  ;;  %v643_v16 = vpack.c.bf16 %v2689_v58, %v2687_v15 }
 0x22e   :  { %1504 = vmatmul.msk.bf16.gmra.mxu0 %vm2706_vm2, %v1554_v25 }
 0x232   :  { %v593_v26 = vpop.f32.mrf.mxu3 }
 0x233   :  { %v2098_v27 = vadd.f32 %v593_v26, %v1930_v40  ;;  %v2116_v40 = vadd.f32 %v585_v19, %v1967_v63  ;;  %v647_v63 = vpack.c.bf16 %v2693_v33, %v2692_v47  ;;  %v2151_v26 = vpop.permute.xlu1 %779 }
 0x235   :  { %v2695_v12 = vmax.f32 %v2098_v27, 0.0  ;;  %v2691_v24 = vmax.f32 %v2116_v40, 0.0 }
 0x237   :  { %v645_v7 = vpack.c.bf16 %v2691_v24, %v2690_v10 }
 0x23a   :  { %v595_v28 = vpop.f32.mrf.mxu3 }
 0x23b   :  { %v2107_v31 = vadd.f32 %v595_v28, %v1937_v45  ;;  %v775_v28 = vpop.permute.xlu0 %774 }
 0x23d   :  { %v2694_v20 = vmax.f32 %v2107_v31, 0.0 }
 0x23e   :  { %1505 = vmatmul.msk.bf16.gmra.mxu0 %vm2706_vm2, %v1555_v29 }
 0x23f   :  { %v649_v45 = vpack.c.bf16 %v2694_v20, %v2695_v12 }
 0x241   :  { %688 = vmatpush.bf16.msrb.mxu2 %v649_v45 }
 0x243   :  { %v770_v14 = vpop.permute.xlu0 %769 }
 0x245   :  { %689 = vmatpush.bf16.msrb.mxu2 %v647_v63  ;;  %v2153_v63 = vpop.permute.xlu2 %764 }
 0x249   :  { %690 = vmatpush.bf16.msrb.mxu2 %v645_v7  ;;  %v2157_v7 = vpop.permute.xlu1 %754 }
 0x24d   :  { %691 = vmatpush.bf16.msrb.mxu2 %v643_v16 }
 0x250   :  { %1498 = vmatmul.msk.bf16.vlgmr.msrb.gmra.mxu2 %vm2706_vm2, %v1552_v17 }
 0x260   :  { %1499 = vmatmul.msk.bf16.gmra.mxu2 %vm2706_vm2, %v1553_v21 }
 0x270   :  { %1500 = vmatmul.msk.bf16.gmra.mxu2 %vm2706_vm2, %v1554_v25 }
 0x280   :  { %1501 = vmatmul.msk.bf16.gmra.mxu2 %vm2706_vm2, %v1555_v29 }
 0x28b   :  { %v722_v62 = vpop.f32.mrf.mxu0 }
 0x293   :  { %v724_v1 = vpop.f32.mrf.mxu0 }
 0x294   :  { %v725_v53 = vadd.f32 %v724_v1, %v2047_v35 }
 0x29b   :  { %v727_v18 = vpop.f32.mrf.mxu0 }
 0x29c   :  { %v728_v4 = vadd.f32 %v727_v18, %v2051_v37  ;;  %v745_v18 = vpop.permute.xlu0 %744 }
 0x2a3   :  { %v729_v19 = vpop.f32.mrf.mxu0 }
 0x2a4   :  { %v730_v8 = vadd.f32 %v729_v19, %v2055_v39  ;;  %v750_v19 = vpop.permute.xlu1 %749 }
 0x2ab   :  { %v732_v22 = vpop.f32.mrf.mxu0 }
 0x2ac   :  { %v733_v29 = vadd.f32 %v732_v22, %v2059_v41 }
 0x2b3   :  { %v734_v23 = vpop.f32.mrf.mxu0 }
 0x2b4   :  { %v735_v21 = vadd.f32 %v734_v23, %v2063_v43  ;;  %v760_v23 = vpop.permute.xlu2 %759 }
 0x2b5   :  { %v789_v15 = vadd.f32 %v760_v23, %v730_v8 }
 0x2b6   :  { %v793_v9 = vadd.f32 %v770_v14, %v735_v21 }
 0x2b7   :  { %v805_v21 = vmax.f32 %v789_v15, 0.0  ;;  %v1557_v15 = vld [vmem:[%s2677_s3 + $0x28] sm:$0xff] }
 0x2b8   :  { %v809_v41 = vmax.f32 %v793_v9, 0.0 }
 0x2bb   :  { %v737_v45 = vpop.f32.mrf.mxu0 }
 0x2bc   :  { %v738_v17 = vadd.f32 %v737_v45, %v2067_v46  ;;  %v791_v46 = vadd.f32 %v2153_v63, %v733_v29 }
 0x2be   :  { %v795_v16 = vadd.f32 %v775_v28, %v738_v17  ;;  %v787_v17 = vadd.f32 %v2157_v7, %v728_v4  ;;  %v807_v39 = vmax.f32 %v791_v46, 0.0  ;;  %v1556_v4 = vld [vmem:[%s2677_s3 + $0x20] sm:$0xff]  ;;  %v1558_v46 = vld [vmem:[%s2677_s3 + $0x30] sm:$0xff] }
 0x2c0   :  { %v811_v45 = vmax.f32 %v795_v16, 0.0  ;;  %v819_v37 = vpack.c.bf16 %v809_v41, %v807_v39  ;;  %v803_v29 = vmax.f32 %v787_v17, 0.0  ;;  %v1559_v41 = vld [vmem:[%s2677_s3 + $0x38] sm:$0xff] }
 0x2c2   :  { %v817_v16 = vpack.c.bf16 %v805_v21, %v803_v29 }
 0x2c3   :  { %v739_v25 = vpop.f32.mrf.mxu0 }
 0x2c4   :  { %v740_v13 = vadd.f32 %v739_v25, %v2071_v51  ;;  %v723_v51 = vadd.f32 %v722_v62, %v2043_v34 }
 0x2c6   :  { %v797_v6 = vadd.f32 %v2151_v26, %v740_v13  ;;  %v785_v13 = vadd.f32 %v750_v19, %v725_v53  ;;  %v783_v25 = vadd.f32 %v745_v18, %v723_v51 }
 0x2c8   :  { %v813_v43 = vmax.f32 %v797_v6, 0.0  ;;  %v801_v6 = vmax.f32 %v785_v13, 0.0  ;;  %v799_v8 = vmax.f32 %v783_v25, 0.0 }
 0x2ca   :  { %v821_v22 = vpack.c.bf16 %v813_v43, %v811_v45  ;;  %v815_v9 = vpack.c.bf16 %v801_v6, %v799_v8 }
 0x2cc   :  { %927 = vmatpush.bf16.msra.mxu1 %v821_v22 }
 0x2d0   :  { %928 = vmatpush.bf16.msra.mxu1 %v819_v37 }
 0x2d3   :  { %v693_v35 = vpop.f32.mrf.mxu2 }
 0x2d4   :  { %929 = vmatpush.bf16.msra.mxu1 %v817_v16 }
 0x2d8   :  { %930 = vmatpush.bf16.msra.mxu1 %v815_v9 }
 0x2db   :  { %v695_v34 = vpop.f32.mrf.mxu2  ;;  %1526 = vmatmul.msk.bf16.vlgmr.msra.gmra.mxu1 %vm2706_vm2, %v1556_v4 }
 0x2e3   :  { %v698_v53 = vpop.f32.mrf.mxu2 }
 0x2e4   :  { %v699_v6 = vadd.f32 %v698_v53, %v2053_v38 }
 0x2eb   :  { %v700_v62 = vpop.f32.mrf.mxu2  ;;  %1527 = vmatmul.msk.bf16.gmra.mxu1 %vm2706_vm2, %v1557_v15 }
 0x2ec   :  { %v701_v37 = vadd.f32 %v700_v62, %v2057_v0 }
 0x2ee   :  { %v788_v9 = vadd.f32 %v760_v23, %v701_v37 }
 0x2f3   :  { %v703_v1 = vpop.f32.mrf.mxu2 }
 0x2f4   :  { %v704_v39 = vadd.f32 %v703_v1, %v2061_v42  ;;  %v694_v42 = vadd.f32 %v693_v35, %v2045_v59  ;;  %v2201_v35 = vpop.permute.xlu0 %859 }
 0x2f6   :  { %v790_v16 = vadd.f32 %v2153_v63, %v704_v39  ;;  %v782_v62 = vadd.f32 %v745_v18, %v694_v42  ;;  %v2199_v18 = vpop.permute.xlu2 %854 }
 0x2f8   :  { %v798_v1 = vmax.f32 %v782_v62, 0.0 }
 0x2fb   :  { %v705_v45 = vpop.f32.mrf.mxu2  ;;  %1528 = vmatmul.msk.bf16.gmra.mxu1 %vm2706_vm2, %v1558_v46 }
 0x2fc   :  { %v706_v51 = vadd.f32 %v705_v45, %v2065_v44  ;;  %v696_v44 = vadd.f32 %v695_v34, %v2049_v36 }
 0x2fe   :  { %v792_v25 = vadd.f32 %v770_v14, %v706_v51  ;;  %v784_v0 = vadd.f32 %v750_v19, %v696_v44  ;;  %v804_v14 = vmax.f32 %v788_v9, 0.0  ;;  %v850_v51 = vpop.permute.xlu2 %849 }
 0x300   :  { %v808_v45 = vmax.f32 %v792_v25, 0.0  ;;  %v800_v63 = vmax.f32 %v784_v0, 0.0 }
 0x302   :  { %v814_v36 = vpack.c.bf16 %v800_v63, %v798_v1 }
 0x303   :  { %v708_v43 = vpop.f32.mrf.mxu2 }
 0x304   :  { %v709_v22 = vadd.f32 %v708_v43, %v2069_v49 }
 0x306   :  { %v794_v13 = vadd.f32 %v775_v28, %v709_v22  ;;  %v806_v28 = vmax.f32 %v790_v16, 0.0 }
 0x308   :  { %v810_v49 = vmax.f32 %v794_v13, 0.0  ;;  %v825_v13 = vpop.permute.xlu2 %824 }
 0x30b   :  { %v710_v17 = vpop.f32.mrf.mxu2  ;;  %1529 = vmatmul.msk.bf16.gmra.mxu1 %vm2706_vm2, %v1559_v41 }
 0x30c   :  { %v711_v21 = vadd.f32 %v710_v17, %v2073_v52  ;;  %v786_v52 = vadd.f32 %v2157_v7, %v699_v6  ;;  %v835_v17 = vpop.permute.xlu0 %834 }
 0x30e   :  { %v796_v29 = vadd.f32 %v2151_v26, %v711_v21  ;;  %v818_v26 = vpack.c.bf16 %v808_v45, %v806_v28  ;;  %v802_v38 = vmax.f32 %v786_v52, 0.0 }
 0x310   :  { %v812_v8 = vmax.f32 %v796_v29, 0.0  ;;  %v816_v53 = vpack.c.bf16 %v804_v14, %v802_v38 }
 0x312   :  { %v820_v43 = vpack.c.bf16 %v812_v8, %v810_v49 }
 0x314   :  { %898 = vmatpush.bf16.msra.mxu3 %v820_v43 }
 0x318   :  { %899 = vmatpush.bf16.msra.mxu3 %v818_v26 }
 0x31c   :  { %900 = vmatpush.bf16.msra.mxu3 %v816_v53 }
 0x320   :  { %901 = vmatpush.bf16.msra.mxu3 %v814_v36 }
 0x323   :  { %1522 = vmatmul.msk.bf16.vlgmr.msra.gmra.mxu3 %vm2706_vm2, %v1556_v4 }
 0x333   :  { %1523 = vmatmul.msk.bf16.gmra.mxu3 %vm2706_vm2, %v1557_v15 }
 0x343   :  { %1524 = vmatmul.msk.bf16.gmra.mxu3 %vm2706_vm2, %v1558_v46  ;;  %v845_v46 = vpop.permute.xlu1 %844 }
 0x34b   :  { %v840_v9 = vpop.permute.xlu1 %839 }
 0x353   :  { %1525 = vmatmul.msk.bf16.gmra.mxu3 %vm2706_vm2, %v1559_v41  ;;  %v830_v41 = vpop.permute.xlu0 %829 }
 0x358   :  { %v932_v59 = vpop.f32.mrf.mxu1 }
 0x359   :  { %v933_v15 = vadd.f32 %v932_v59, %v825_v13 }
 0x35b   :  { %v1531_v37 = vmul.f32 -1.442695, %v933_v15 }
 0x35d   :  { %1605 = vpow2.f32 %v1531_v37 }
 0x360   :  { %v934_v7 = vpop.f32.mrf.mxu1 }
 0x361   :  { %v935_v29 = vadd.f32 %v934_v7, %v830_v41 }
 0x363   :  { %v1533_v16 = vmul.f32 -1.442695, %v935_v29  ;;  %v1606_v44 = vpop.eup %1605 }
 0x364   :  { %v2203_v28 = vadd.f32 1.0, %v1606_v44 }
 0x365   :  { %1607 = vpow2.f32 %v1533_v16 }
 0x366   :  { %2715 = vst [vmem:[#allocation10_spill] sm:$0xff] %v2203_v28 }
 0x368   :  { %v937_v23 = vpop.f32.mrf.mxu1 }
 0x369   :  { %v938_v45 = vadd.f32 %v937_v23, %v835_v17 }
 0x36b   :  { %v1535_v14 = vmul.f32 -1.442695, %v938_v45  ;;  %v1608_v63 = vpop.eup %1607 }
 0x370   :  { %v939_v19 = vpop.f32.mrf.mxu1 }
 0x371   :  { %v940_v43 = vadd.f32 %v939_v19, %v840_v9  ;;  %v2208_v19 = vadd.f32 1.0, %v1608_v63 }
 0x373   :  { %v1537_v62 = vmul.f32 -1.442695, %v940_v43 }
 0x378   :  { %v942_v34 = vpop.f32.mrf.mxu1 }
 0x379   :  { %v943_v6 = vadd.f32 %v942_v34, %v845_v46 }
 0x37b   :  { %v1539_v49 = vmul.f32 -1.442695, %v943_v6 }
 0x37d   :  { %1609 = vpow2.f32 %v1539_v49 }
 0x37e   :  { %1611 = vrcp.f32 %v2203_v28 }
 0x37f   :  { %1613 = vpow2.f32 %v1535_v14 }
 0x380   :  { %v944_v39 = vpop.f32.mrf.mxu1  ;;  %1615 = vpow2.f32 %v1537_v62 }
 0x381   :  { %v945_v52 = vadd.f32 %v944_v39, %v850_v51 }
 0x383   :  { %v1541_v53 = vmul.f32 -1.442695, %v945_v52  ;;  %v1610_v1 = vpop.eup %1609 }
 0x384   :  { %v2210_v39 = vadd.f32 1.0, %v1610_v1  ;;  %v2212_v6 = vpop.eup %1611 }
 0x385   :  { %1617 = vpow2.f32 %v1541_v53 }
 0x388   :  { %v947_v25 = vpop.f32.mrf.mxu1 }
 0x389   :  { %v948_v0 = vadd.f32 %v947_v25, %v2199_v18 }
 0x38b   :  { %v1543_v36 = vmul.f32 -1.442695, %v948_v0 }
 0x38d   :  { %1619 = vpow2.f32 %v1543_v36 }
 0x390   :  { %v949_v42 = vpop.f32.mrf.mxu1 }
 0x391   :  { %v950_v26 = vadd.f32 %v949_v42, %v2201_v35 }
 0x393   :  { %v1545_v7 = vmul.f32 -1.442695, %v950_v26 }
 0x395   :  { %1621 = vpow2.f32 %v1545_v7 }
 0x396   :  { %1623 = vrcp.f32 %v2208_v19 }
 0x397   :  { %1625 = vrcp.f32 %v2210_v39 }
 0x3a6   :  { %v903_v22 = vpop.f32.mrf.mxu3 }
 0x3a7   :  { %v904_v59 = vadd.f32 %v903_v22, %v825_v13 }
 0x3a9   :  { %v1530_v15 = vmul.f32 -1.442695, %v904_v59 }
 0x3ab   :  { %1627 = vpow2.f32 %v1530_v15 }
 0x3ae   :  { %v905_v4 = vpop.f32.mrf.mxu3 }
 0x3af   :  { %v906_v23 = vadd.f32 %v905_v4, %v830_v41  ;;  %v1614_v4 = vpop.eup %1613 }
 0x3b0   :  { %v2216_v45 = vadd.f32 1.0, %v1614_v4 }
 0x3b1   :  { %v1532_v25 = vmul.f32 -1.442695, %v906_v23 }
 0x3b3   :  { %1629 = vpow2.f32 %v1532_v25  ;;  %v1032_v25 = vmul.f32 %v2212_v6, %v2203_v28 }
 0x3b6   :  { %v908_v21 = vpop.f32.mrf.mxu3 }
 0x3b7   :  { %v909_v34 = vadd.f32 %v908_v21, %v835_v17  ;;  %v1616_v17 = vpop.eup %1615 }
 0x3b8   :  { %v1618_v16 = vpop.eup %1617 }
 0x3b9   :  { %v1534_v22 = vmul.f32 -1.442695, %v909_v34  ;;  %v1620_v44 = vpop.eup %1619  ;;  %v2222_v42 = vadd.f32 1.0, %v1618_v16 }
 0x3ba   :  { %v2226_v52 = vadd.f32 1.0, %v1620_v44 }
 0x3bb   :  { %1631 = vpow2.f32 %v1534_v22 }
 0x3be   :  { %v910_v8 = vpop.f32.mrf.mxu3 }
 0x3bf   :  { %v911_v29 = vadd.f32 %v910_v8, %v840_v9  ;;  %v1622_v8 = vpop.eup %1621  ;;  %v2218_v9 = vadd.f32 1.0, %v1616_v17 }
 0x3c0   :  { %v2220_v43 = vpop.eup %1623  ;;  %v2229_v14 = vadd.f32 1.0, %v1622_v8 }
 0x3c1   :  { %v1536_v49 = vmul.f32 -1.442695, %v911_v29 }
 0x3c6   :  { %v913_v38 = vpop.f32.mrf.mxu3 }
 0x3c7   :  { %v914_v37 = vadd.f32 %v913_v38, %v845_v46 }
 0x3c9   :  { %v1538_v21 = vmul.f32 -1.442695, %v914_v37 }
 0x3ce   :  { %v915_v13 = vpop.f32.mrf.mxu3 }
 0x3cf   :  { %v916_v41 = vadd.f32 %v915_v13, %v850_v51  ;;  %v2224_v51 = vpop.eup %1625  ;;  %v1062_v13 = vmul.f32 %v2220_v43, %v2208_v19 }
 0x3d0   :  { %v1628_v0 = vpop.eup %1627  ;;  %v1152_v4 = vmul.f32 %v2224_v51, %v2210_v39 }
 0x3d1   :  { %v1540_v46 = vmul.f32 -1.442695, %v916_v41  ;;  %v1630_v62 = vpop.eup %1629  ;;  %v2235_v1 = vadd.f32 1.0, %v1628_v0  ;;  %v1033_v0 = vsub.f32 1.0, %v1032_v25 }
 0x3d2   :  { %v1632_v63 = vpop.eup %1631  ;;  %v2238_v7 = vadd.f32 1.0, %v1630_v62 }
 0x3d3   :  { %1633 = vpow2.f32 %v1540_v46  ;;  %v2240_v34 = vadd.f32 1.0, %v1632_v63  ;;  %v1153_v63 = vsub.f32 1.0, %v1152_v4 }
 0x3d4   :  { %1635 = vpow2.f32 %v1538_v21 }
 0x3d5   :  { %1637 = vpow2.f32 %v1536_v49  ;;  %vm1081_vm12 = vweird.f32 %v2240_v34 }
 0x3d6   :  { %1639 = vrcp.f32 %v2216_v45  ;;  %v918_v26 = vpop.f32.mrf.mxu3 }
 0x3d7   :  { %1641 = vrcp.f32 %v2218_v9  ;;  %v919_v38 = vadd.f32 %v918_v26, %v2199_v18 }
 0x3d8   :  { %1643 = vrcp.f32 %v2222_v42 }
 0x3d9   :  { %v1634_v53 = vpop.eup %1633  ;;  %1645 = vrcp.f32 %v2226_v52  ;;  %v1542_v36 = vmul.f32 -1.442695, %v919_v38  ;;  %v1063_v38 = vsub.f32 1.0, %v1062_v13 }
 0x3da   :  { %v1636_v59 = vpop.eup %1635  ;;  %1647 = vrcp.f32 %v2229_v14  ;;  %v2244_v18 = vadd.f32 1.0, %v1634_v53 }
 0x3db   :  { %v1638_v23 = vpop.eup %1637  ;;  %1649 = vpow2.f32 %v1542_v36  ;;  %v2251_v29 = vadd.f32 1.0, %v1636_v59  ;;  %v2302_v13 = vmul.f32 %v2220_v43, %v1063_v38 }
 0x3dc   :  { %v2242_v15 = vpop.eup %1639  ;;  %1651 = vrcp.f32 %v2235_v1  ;;  %v2260_v41 = vadd.f32 1.0, %v1638_v23  ;;  %vm1171_vm9 = vweird.f32 %v2244_v18 }
 0x3dd   :  { %v2246_v37 = vpop.eup %1641  ;;  %1653 = vrcp.f32 %v2238_v7  ;;  %v1092_v16 = vmul.f32 %v2242_v15, %v2216_v45  ;;  %2717 = vst [vmem:[#allocation12_spill] sm:$0xff] %v2302_v13  ;;  %vm1141_vm3 = vweird.f32 %v2251_v29 }
 0x3de   :  { %v2253_v22 = vpop.eup %1643  ;;  %v920_v17 = vpop.f32.mrf.mxu3  ;;  %1655 = vrcp.f32 %v2240_v34  ;;  %v1122_v44 = vmul.f32 %v2246_v37, %v2218_v9  ;;  %vm1111_vm7 = vweird.f32 %v2260_v41 }
 0x3df   :  { %v2262_v21 = vpop.eup %1645  ;;  %v921_v49 = vadd.f32 %v920_v17, %v2201_v35  ;;  %1657 = vrcp.f32 %v2244_v18  ;;  %v1182_v26 = vmul.f32 %v2253_v22, %v2222_v42  ;;  %v1093_v36 = vsub.f32 1.0, %v1092_v16 }
 0x3e0   :  { %v2268_v46 = vpop.eup %1647  ;;  %1659 = vrcp.f32 %v2251_v29  ;;  %v1212_v59 = vmul.f32 %v2262_v21, %v2226_v52  ;;  %v1123_v17 = vsub.f32 1.0, %v1122_v44  ;;  %v2293_v16 = vmul.f32 %v2212_v6, %v1033_v0 }
 0x3e1   :  { %v1650_v8 = vpop.eup %1649  ;;  %v1544_v62 = vmul.f32 -1.442695, %v921_v49  ;;  %1661 = vrcp.f32 %v2260_v41  ;;  %v1242_v23 = vmul.f32 %v2268_v46, %v2229_v14  ;;  %v1183_v49 = vsub.f32 1.0, %v1182_v26 }
 0x3e2   :  { %v2277_v35 = vadd.f32 1.0, %v1650_v8  ;;  %v2279_v53 = vpop.eup %1651  ;;  %2716 = vst [vmem:[#allocation11_spill] sm:$0xff] %v2293_v16  ;;  %v1213_v26 = vsub.f32 1.0, %v1212_v59  ;;  %v2308_v47 = vmul.f32 %v2242_v15, %v1093_v36  ;;  %v2317_v38 = vmul.f32 %v2246_v37, %v1123_v17 }
 0x3e3   :  { %1663 = vpow2.f32 %v1544_v62  ;;  %v2285_v25 = vpop.eup %1653  ;;  %v1154_v62 = vmul.f32 %v2224_v51, %v1153_v63  ;;  %v1243_v8 = vsub.f32 1.0, %v1242_v23  ;;  %v1017_v63 = vmul.f32 %v2279_v53, %v2235_v1 }
 0x3e4   :  { %1665 = vrcp.f32 %v2277_v35  ;;  %v2289_v4 = vpop.eup %1655  ;;  %v1047_v59 = vmul.f32 %v2285_v25, %v2238_v7  ;;  %v1184_v23 = vmul.f32 %v2253_v22, %v1183_v49  ;;  %v1214_v5 = vmul.f32 %v2262_v21, %v1213_v26 }
 0x3e5   :  { %v2296_v58 = vpop.eup %1657  ;;  %v1077_v44 = vmul.f32 %v2289_v4, %v2240_v34  ;;  %v2334_v12 = vadd.f32 %v2224_v51, %v1154_v62  ;;  %v1244_v11 = vmul.f32 %v2268_v46, %v1243_v8  ;;  %v1018_v2 = vsub.f32 1.0, %v1017_v63 }
 0x3e6   :  { %v2304_v24 = vpop.eup %1659  ;;  %v1167_v36 = vmul.f32 %v2296_v58, %v2244_v18  ;;  %v1048_v60 = vsub.f32 1.0, %v1047_v59  ;;  %v2346_v26 = vadd.f32 %v2253_v22, %v1184_v23  ;;  %v2352_v61 = vadd.f32 %v2262_v21, %v1214_v5 }
 0x3e7   :  { %v2310_v54 = vpop.eup %1661  ;;  %v1137_v17 = vmul.f32 %v2304_v24, %v2251_v29  ;;  %v1078_v8 = vsub.f32 1.0, %v1077_v44  ;;  %v2355_v3 = vadd.f32 %v2268_v46, %v1244_v11  ;;  %v2360_v44 = vmul.f32 %v2279_v53, %v1018_v2 }
 0x3e8   :  { %v1107_v49 = vmul.f32 %v2310_v54, %v2260_v41  ;;  %v1168_v62 = vsub.f32 1.0, %v1167_v36  ;;  %v1049_v5 = vmul.f32 %v2285_v25, %v1048_v60  ;;  %vm1112_vm4 = vweird.f32 %v2310_v54 }
 0x3e9   :  { %v1664_v33 = vpop.eup %1663  ;;  %v1138_v57 = vsub.f32 1.0, %v1137_v17  ;;  %vm1082_vm6 = vweird.f32 %v2289_v4  ;;  %vm1142_vm8 = vweird.f32 %v2304_v24  ;;  %vm1172_vm10 = vweird.f32 %v2296_v58 }
 0x3ea   :  { %v2325_v20 = vpop.eup %1665  ;;  %v2331_v10 = vadd.f32 1.0, %v1664_v33  ;;  %v1108_v48 = vsub.f32 1.0, %v1107_v49  ;;  %v1169_v23 = vmul.f32 %v2296_v58, %v1168_v62  ;;  %v1079_v33 = vmul.f32 %v2289_v4, %v1078_v8  ;;  %vm2408_vm2 = vmor %vm1171_vm9, %vm1172_vm10 }
 0x3eb   :  { %v1197_v0 = vmul.f32 %v2325_v20, %v2277_v35  ;;  %v1139_v11 = vmul.f32 %v2304_v24, %v1138_v57  ;;  %vm1202_vm5 = vweird.f32 %v2325_v20  ;;  %v1207_v57 = vand.u32 2147483648, %v2277_v35  ;;  %vm2419_vm15 = vmor %vm1141_vm3, %vm1142_vm8 }
 0x3ec   :  { %1667 = vrcp.f32 %v2331_v10  ;;  %v1109_v62 = vmul.f32 %v2310_v54, %v1108_v48  ;;  %vm1201_vm11 = vweird.f32 %v2277_v35  ;;  %v1205_v8 = vand.u32 2147483647, %v2277_v35 }
 0x3ed   :  { %v1198_v28 = vsub.f32 1.0, %v1197_v0  ;;  %vm1052_vm13 = vweird.f32 %v2285_v25  ;;  %vm2386_vm14 = vmor %vm1201_vm11, %vm1202_vm5  ;;  %v1237_v36 = vand.u32 2147483648, %v2331_v10  ;;  %v1140_v13 = vadd.f32 %v2304_v24, %v1139_v11 }
 0x3ee   :  { %v1175_v0 = vand.u32 2147483647, %v2244_v18  ;;  %v1235_v59 = vand.u32 2147483647, %v2331_v10  ;;  %vm1051_vm5 = vweird.f32 %v2238_v7  ;;  %v1208_v11 = vor.u32 1.1754944e-38, %v1207_v57 }
 0x3ef   :  { %v1199_v63 = vmul.f32 %v2325_v20, %v1198_v28  ;;  %v1145_v17 = vand.u32 2147483647, %v2251_v29  ;;  %v1147_v28 = vand.u32 2147483648, %v2251_v29  ;;  %vm1231_vm1 = vweird.f32 %v2331_v10 }
 0x3f0   :  { %vm1206_vm11 = vcmp.eq.f32.partialorder %v1205_v8, 8.507059e+37  ;;  %vm1216_vm9 = vweird.f32 %v2226_v52  ;;  %v1080_v48 = vadd.f32 %v2289_v4, %v1079_v33  ;;  %vm1236_vm3 = vcmp.eq.f32.partialorder %v1235_v59, 8.507059e+37 }
 0x3f1   :  { %v1200_v16 = vadd.f32 %v2325_v20, %v1199_v63  ;;  %v1170_v63 = vadd.f32 %v2296_v58, %v1169_v23  ;;  %vm1176_vm8 = vcmp.eq.f32.partialorder %v1175_v0, 8.507059e+37  ;;  %v1050_v33 = vadd.f32 %v2285_v25, %v1049_v5 }
 0x3f2   :  { %v1668_v49 = vpop.eup %1667  ;;  %v2727_v0 = vmax.f32 %v2107_v31, 0.0  ;;  %v1020_v31 = vadd.f32 %v2279_v53, %v2360_v44  ;;  %v1125_v5 = vadd.f32 %v2246_v37, %v2317_v38  ;;  %v2762_v38 = vand.u32 2147483647, %v2222_v42 }
 0x3f3   :  { %v1227_v2 = vmul.f32 %v1668_v49, %v2331_v10  ;;  %v1204_v23 = vsel %vm2386_vm14, %v2325_v20, %v1200_v16  ;;  %vm1232_vm0 = vweird.f32 %v1668_v49  ;;  %v1110_v16 = vadd.f32 %v2310_v54, %v1109_v62 }
 0x3f4   :  { %v1209_v62 = vsel %vm1206_vm11, %v1208_v11, %v1204_v23  ;;  %vm1233_vm10 = vmor %vm1231_vm1, %vm1232_vm0  ;;  %v1238_v10 = vor.u32 1.1754944e-38, %v1237_v36  ;;  %vm1187_vm14 = vweird.f32 %v2253_v22  ;;  %vm1157_vm0 = vweird.f32 %v2224_v51 }
 0x3f5   :  { %v1228_v60 = vsub.f32 1.0, %v1227_v2  ;;  %v1177_v2 = vand.u32 2147483648, %v2244_v18  ;;  %v1174_v18 = vsel %vm2408_vm2, %v2296_v58, %v1170_v63  ;;  %v1148_v58 = vor.u32 1.1754944e-38, %v1147_v28  ;;  %vm2437_vm2 = vmor %vm1111_vm7, %vm1112_vm4 }
 0x3f6   :  { %vm1186_vm1 = vweird.f32 %v2222_v42  ;;  %v1114_v28 = vsel %vm2437_vm2, %v2310_v54, %v1110_v16  ;;  %vm2455_vm4 = vmor %vm1081_vm12, %vm1082_vm6  ;;  %vm1156_vm7 = vweird.f32 %v2210_v39  ;;  %vm1127_vm11 = vweird.f32 %v2246_v37 }
 0x3f7   :  { %v1229_v35 = vmul.f32 %v1668_v49, %v1228_v60  ;;  %v1178_v8 = vor.u32 1.1754944e-38, %v1177_v2  ;;  %v2731_v23 = vmax.f32 %v2104_v30, 0.0  ;;  %v1084_v16 = vsel %vm2455_vm4, %v2289_v4, %v1080_v48 }
 0x3f8   :  { %v2733_v60 = vand.u32 2147483648, %v2240_v34  ;;  %vm1021_vm12 = vweird.f32 %v2235_v1  ;;  %vm2742_vm4 = vweird.f32 %v2279_v53  ;;  %v2770_v30 = vand.u32 2147483647, %v2210_v39 }
 0x3f9   :  { %v1230_v57 = vadd.f32 %v1668_v49, %v1229_v35  ;;  %v1144_v35 = vsel %vm2419_vm15, %v2304_v24, %v1140_v13  ;;  %v1179_v63 = vsel %vm1176_vm8, %v1178_v8, %v1174_v18  ;;  %v2726_v24 = vmax.f32 %v2098_v27, 0.0 }
 0x3fa   :  { %vm1146_vm15 = vcmp.eq.f32.partialorder %v1145_v17, 8.507059e+37  ;;  %v2730_v27 = vand.u32 2147483648, %v2260_v41  ;;  %v1057_v17 = vand.u32 2147483648, %v2238_v7  ;;  %v1266_v11 = vmul.f32 %v1179_v63, %v2731_v23 }
 0x3fb   :  { %v1234_v29 = vsel %vm1233_vm10, %v1668_v49, %v1230_v57  ;;  %v1268_v13 = vmul.f32 %v1209_v62, %v2726_v24  ;;  %v1149_v49 = vsel %vm1146_vm15, %v1148_v58, %v1144_v35  ;;  %v2732_v57 = vand.u32 2147483647, %v2260_v41  ;;  %vm2481_vm10 = vmor %vm1051_vm5, %vm1052_vm13 }
 0x3fc   :  { %v1239_v20 = vsel %vm1236_vm3, %v1238_v10, %v1234_v29  ;;  %v1118_v2 = vor.u32 1.1754944e-38, %v2730_v27  ;;  %v1088_v44 = vor.u32 1.1754944e-38, %v2733_v60  ;;  %v1027_v62 = vand.u32 2147483648, %v2235_v1 }
 0x3fd   :  { %v1270_v59 = vmul.f32 %v1239_v20, %v2727_v0  ;;  %vm1116_vm6 = vcmp.eq.f32.partialorder %v2732_v57, 8.507059e+37  ;;  %vm1097_vm3 = vweird.f32 %v2242_v15  ;;  %vm1126_vm8 = vweird.f32 %v2218_v9 }
 0x3fe   :  { %v1119_v18 = vsel %vm1116_vm6, %v1118_v2, %v1114_v28  ;;  %v2736_v41 = vmax.f32 %v2110_v32, 0.0  ;;  %v2737_v10 = vand.u32 2147483647, %v2240_v34  ;;  %v1025_v8 = vand.u32 2147483647, %v2235_v1  ;;  %vm2505_vm6 = vmor %vm1021_vm12, %vm2742_vm4  ;;  %v2775_v32 = vld [vmem:[#allocation11_spill] sm:$0xff] }
 0x3ff   :  { %v1278_v54 = vpack.c.bf16 %v1270_v59, %v1268_v13  ;;  %v1054_v48 = vsel %vm2481_vm10, %v2285_v25, %v1050_v33  ;;  %vm2738_vm13 = vweird.f32 %v2268_v46  ;;  %vm2739_vm5 = vweird.f32 %v2229_v14 }
 0x400   :  { %v1264_v4 = vmul.f32 %v1149_v49, %v2736_v41  ;;  %vm1086_vm2 = vcmp.eq.f32.partialorder %v2737_v10, 8.507059e+37  ;;  %vm2499_vm15 = vmor %vm2739_vm5, %vm2738_vm13  ;;  %v1058_v1 = vor.u32 1.1754944e-38, %v1057_v17  ;;  %v2745_v25 = vand.u32 2147483648, %v2229_v14 }
 0x401   :  { %1302 = vmatpush.bf16.msra.mxu2 %v1278_v54  ;;  %v1089_v35 = vsel %vm1086_vm2, %v1088_v44, %v1084_v16  ;;  %v1249_v34 = vsel %vm2499_vm15, %v2268_v46, %v2355_v3  ;;  %vm1096_vm10 = vweird.f32 %v2216_v45  ;;  %vm1067_vm13 = vweird.f32 %v2220_v43  ;;  %v2763_v16 = vld [vmem:[#allocation9_spill] sm:$0xff]  ;;  %v2779_v3 = vld [vmem:[#allocation10_spill] sm:$0xff] }
 0x402   :  { %v1253_v20 = vor.u32 1.1754944e-38, %v2745_v25  ;;  %v1276_v58 = vpack.c.bf16 %v1266_v11, %v1264_v4  ;;  %v2746_v63 = vmax.f32 %v2116_v40, 0.0  ;;  %v1024_v33 = vsel %vm2505_vm6, %v2279_v53, %v1020_v31  ;;  %v2771_v4 = vld [vmem:[#allocation12_spill] sm:$0xff]  ;;  %v2776_v25 = vld [vmem:[#allocation3_spill] sm:$0xff] }
 0x403   :  { %v2747_v24 = vand.u32 2147483647, %v2238_v7  ;;  %vm2748_vm2 = vweird.f32 %v2262_v21  ;;  %v1028_v46 = vor.u32 1.1754944e-38, %v1027_v62  ;;  %v2751_v53 = vand.u32 2147483647, %v2229_v14 }
 0x404   :  { %v1262_v36 = vmul.f32 %v1119_v18, %v2746_v63  ;;  %vm2528_vm5 = vmor %vm1216_vm9, %vm2748_vm2  ;;  %vm1037_vm4 = vweird.f32 %v2212_v6  ;;  %vm1066_vm6 = vweird.f32 %v2208_v19  ;;  %v2752_v7 = vmax.f32 %v2124_v56, 0.0 }
 0x405   :  { %vm1056_vm12 = vcmp.eq.f32.partialorder %v2747_v24, 8.507059e+37  ;;  %v1219_v40 = vsel %vm2528_vm5, %v2262_v21, %v2352_v61  ;;  %vm1251_vm15 = vcmp.eq.f32.partialorder %v2751_v53, 8.507059e+37  ;;  %1303 = vmatpush.bf16.msra.mxu2 %v1276_v58  ;;  %vm1026_vm9 = vcmp.eq.f32.partialorder %v1025_v8, 8.507059e+37 }
 0x406   :  { %v1059_v13 = vsel %vm1056_vm12, %v1058_v1, %v1054_v48  ;;  %v1260_v0 = vmul.f32 %v1089_v35, %v2752_v7  ;;  %v2753_v59 = vand.u32 2147483648, %v2226_v52  ;;  %v1254_v49 = vsel %vm1251_vm15, %v1253_v20, %v1249_v34  ;;  %vm2548_vm12 = vmor %vm1186_vm1, %vm1187_vm14  ;;  %v1568_v34 = vld [vmem:[%s2677_s3 + $0x80] sm:$0xff] }
 0x407   :  { %v1029_v14 = vsel %vm1026_vm9, %v1028_v46, %v1024_v33  ;;  %v2756_v21 = vand.u32 2147483647, %v2226_v52  ;;  %v1189_v56 = vsel %vm2548_vm12, %v2253_v22, %v2346_v26  ;;  %v2757_v2 = vmax.f32 %v2127_v55, 0.0  ;;  %vm2566_vm14 = vmor %vm1156_vm7, %vm1157_vm0 }
 0x408   :  { %v1223_v28 = vor.u32 1.1754944e-38, %v2753_v59  ;;  %v1274_v27 = vpack.c.bf16 %v1262_v36, %v1260_v0  ;;  %v2760_v54 = vand.u32 2147483648, %v2222_v42  ;;  %v2761_v22 = vmax.f32 %v1945_v50, 0.0  ;;  %vm2591_vm0 = vmor %vm1126_vm8, %vm1127_vm11  ;;  %v2768_v42 = vld [vmem:[#allocation2_spill] sm:$0xff] }
 0x409   :  { %vm1221_vm2 = vcmp.eq.f32.partialorder %v2756_v21, 8.507059e+37  ;;  %v1258_v31 = vmul.f32 %v1059_v13, %v2757_v2  ;;  %v1159_v55 = vsel %vm2566_vm14, %v2224_v51, %v2334_v12  ;;  %vm1191_vm1 = vcmp.eq.f32.partialorder %v2762_v38, 8.507059e+37  ;;  %vm2608_vm11 = vmor %vm1096_vm10, %vm1097_vm3  ;;  %v2790_v2 = vld [vmem:[#allocation5_spill] sm:$0xff] }
 0x40a   :  { %v1224_v17 = vsel %vm1221_vm2, %v1223_v28, %v1219_v40  ;;  %v1193_v23 = vor.u32 1.1754944e-38, %v2760_v54  ;;  %v1271_v26 = vmul.f32 %v1254_v49, %v2761_v22  ;;  %v1095_v11 = vadd.f32 %v2242_v15, %v2308_v47  ;;  %1304 = vmatpush.bf16.msra.mxu2 %v1274_v27  ;;  %vm2632_vm10 = vmor %vm1066_vm6, %vm1067_vm13 }
 0x40b   :  { %v2764_v57 = vmax.f32 %v2763_v16, 0.0  ;;  %v2765_v44 = vand.u32 2147483648, %v2210_v39  ;;  %v1102_v62 = vand.u32 2147483648, %v2216_v45  ;;  %v2769_v47 = vmax.f32 %v2768_v42, 0.0 }
 0x40c   :  { %v1194_v50 = vsel %vm1191_vm1, %v1193_v23, %v1189_v56  ;;  %vm1161_vm7 = vcmp.eq.f32.partialorder %v2770_v30, 8.507059e+37  ;;  %v1129_v41 = vsel %vm2591_vm0, %v2246_v37, %v1125_v5  ;;  %v1065_v10 = vadd.f32 %v2220_v43, %v2771_v4  ;;  %v2792_v23 = vld [vmem:[#allocation8_spill] sm:$0xff] }
 0x40d   :  { %v1256_v60 = vmul.f32 %v1029_v14, %v2764_v57  ;;  %v1163_v18 = vor.u32 1.1754944e-38, %v2765_v44  ;;  %v1269_v51 = vmul.f32 %v1224_v17, %v2769_v47  ;;  %v2774_v39 = vand.u32 2147483648, %v2218_v9  ;;  %v2787_v14 = vld [vmem:[#allocation6_spill] sm:$0xff] }
 0x40e   :  { %v1035_v1 = vadd.f32 %v2212_v6, %v2775_v32  ;;  %v2777_v20 = vmax.f32 %v2776_v25, 0.0  ;;  %v1099_v63 = vsel %vm2608_vm11, %v2242_v15, %v1095_v11  ;;  %v2778_v36 = vand.u32 2147483647, %v2218_v9  ;;  %v2782_v15 = vld [vmem:[#allocation4_spill] sm:$0xff] }
 0x40f   :  { %v1272_v8 = vpack.c.bf16 %v1258_v31, %v1256_v60  ;;  %v1164_v48 = vsel %vm1161_vm7, %v1163_v18, %v1159_v55  ;;  %v1133_v35 = vor.u32 1.1754944e-38, %v2774_v39  ;;  %v1279_v37 = vpack.c.bf16 %v1271_v26, %v1269_v51  ;;  %v2794_v55 = vld [vmem:[#allocation7_spill] sm:$0xff]  ;;  %v1288_v60 = vpop.permute.xlu2 %1287 }
 0x410   :  { %v1267_v58 = vmul.f32 %v1194_v50, %v2777_v20  ;;  %vm1131_vm3 = vcmp.eq.f32.partialorder %v2778_v36, 8.507059e+37  ;;  %v1103_v33 = vor.u32 1.1754944e-38, %v1102_v62  ;;  %vm1036_vm8 = vweird.f32 %v2779_v3 }
 0x411   :  { %1305 = vmatpush.bf16.msra.mxu2 %v1272_v8  ;;  %v1134_v24 = vsel %vm1131_vm3, %v1133_v35, %v1129_v41  ;;  %v1042_v46 = vand.u32 2147483648, %v2779_v3  ;;  %v2783_v40 = vmax.f32 %v2782_v15, 0.0  ;;  %v2784_v53 = vand.u32 2147483647, %v2216_v45  ;;  %vm1038_vm13 = vmor %vm1036_vm8, %vm1037_vm4 }
 0x412   :  { %v1040_v7 = vand.u32 2147483647, %v2779_v3  ;;  %v1069_v0 = vsel %vm2632_vm10, %v2220_v43, %v1065_v10  ;;  %v2785_v28 = vand.u32 2147483648, %v2208_v19  ;;  %vm2786_vm15 = vcmask 523264  }
 0x413   :  { %v1265_v9 = vmul.f32 %v1164_v48, %v2783_v40  ;;  %vm1101_vm5 = vcmp.eq.f32.partialorder %v2784_v53, 8.507059e+37  ;;  %v2788_v21 = vmax.f32 %v2787_v14, 0.0  ;;  %v1039_v56 = vsel %vm1038_vm13, %v2212_v6, %v1035_v1  ;;  %vm2796_vm9 = vmmov %vm2786_vm15 }
 0x414   :  { %v1104_v59 = vsel %vm1101_vm5, %v1103_v33, %v1099_v63  ;;  %v1073_v49 = vor.u32 1.1754944e-38, %v2785_v28  ;;  %1550 = vmatmul.msk.bf16.vlgmr.msra.gmra.mxu2 %vm2786_vm15, %v1568_v34  ;;  %v2789_v5 = vand.u32 2147483647, %v2208_v19  ;;  %v1043_v27 = vor.u32 1.1754944e-38, %v1042_v46  ;;  %v1283_v19 = vpop.permute.xlu1 %1282 }
 0x415   :  { %1316 = vmatpush.bf16.msrb.mxu2 %v1279_v37  ;;  %v1277_v61 = vpack.c.bf16 %v1267_v58, %v1265_v9  ;;  %v1263_v45 = vmul.f32 %v1134_v24, %v2788_v21  ;;  %v2791_v31 = vmax.f32 %v2790_v2, 0.0  ;;  %vm1041_vm4 = vcmp.eq.f32.partialorder %v1040_v7, 8.507059e+37 }
 0x416   :  { %vm1071_vm6 = vcmp.eq.f32.partialorder %v2789_v5, 8.507059e+37  ;;  %v1044_v52 = vsel %vm1041_vm4, %v1043_v27, %v1039_v56  ;;  %v2793_v22 = vmax.f32 %v2792_v23, 0.0  ;;  %v2795_v38 = vmax.f32 %v2794_v55, 0.0 }
 0x417   :  { %v1074_v43 = vsel %vm1071_vm6, %v1073_v49, %v1069_v0  ;;  %v1261_v17 = vmul.f32 %v1104_v59, %v2791_v31 }
 0x418   :  { %v1259_v26 = vmul.f32 %v1074_v43, %v2793_v22  ;;  %v1257_v11 = vmul.f32 %v1044_v52, %v2795_v38 }
 0x419   :  { %1317 = vmatpush.bf16.msrb.mxu2 %v1277_v61  ;;  %v1275_v54 = vpack.c.bf16 %v1263_v45, %v1261_v17 }
 0x41a   :  { %v1273_v6 = vpack.c.bf16 %v1259_v26, %v1257_v11 }
 0x41d   :  { %1318 = vmatpush.bf16.msrb.mxu2 %v1275_v54 }
 0x421   :  { %1319 = vmatpush.bf16.msrb.mxu2 %v1273_v6 }
 0x424   :  { %1551 = vmatmul.msk.bf16.vlgmr.msrb.gmra.mxu2 %vm2796_vm9, %v1568_v34 }
 0x497   :  { %v1307_v16 = vpop.f32.mrf.mxu2 }
 0x498   :  { %v1308_v57 = vadd.f32 %v1307_v16, %v1283_v19 }
 0x49a   :  { %1326 = vst [vmem:[%s2679_s6] sm:$0xff] %v1308_v57 }
 0x49f   :  { %v1309_v44 = vpop.f32.mrf.mxu2 }
 0x4a0   :  { %v1310_v18 = vadd.f32 %v1309_v44, %v1288_v60 }
 0x4a2   :  { %1328 = vst [vmem:[%s2679_s6 + $0x10] sm:$0xff] %v1310_v18 }
 0x4a7   :  { %v1321_v50 = vpop.f32.mrf.mxu2 }
 0x4a8   :  { %v1322_v62 = vadd.f32 %v1321_v50, %v1283_v19 }
 0x4aa   :  { %1327 = vst [vmem:[%s2679_s6 + $0x8] sm:$0xff] %v1322_v62 }
 0x4af   :  { %v1323_v12 = vpop.f32.mrf.mxu2 }
 0x4b0   :  { %v1324_v42 = vadd.f32 %v1323_v12, %v1288_v60 }
 0x4b2   :  { %1329 = vst [vmem:[%s2679_s6 + $0x18] sm:$0xff] %v1324_v42 }

</bundles_post_ra>
